<compile_context>
chip_gen: v7x
topology: tpu7x:2x2x1
jax: 0.10.0
libtpu: 0.0.40
codegen_flags: <defaults>
</compile_context>

<pallas_src>
import functools

import numpy as np
import jax
import jax.numpy as jnp
from jax.experimental import pallas as pl
from jax.experimental.pallas import tpu as pltpu


# ------------------------------ helpers -------------------------------------

def _round_up(x, m):
    return (x + m - 1) // m * m


def _plan_hw(hw, c, itemsize=2, budget_bytes=2 << 20):
    """Pick (tile, padded extent) for the flattened spatial dim.

    The tile is the largest multiple of 128 whose (c, tile) block stays under
    `budget_bytes` of *physical* VMEM (sublane padding included), so that with
    double buffering and 2-3 operands per kernel we stay well below the
    16/32 MiB scoped-VMEM defaults and v7x's 64 MiB physical VMEM.  hw is then
    padded up to a multiple of the tile so all grid blocks divide evenly."""
    sublane = {4: 8, 2: 16, 1: 32}[itemsize]
    c_phys = _round_up(max(c, 1), sublane)
    cap = max(128, (budget_bytes // (c_phys * itemsize)) // 128 * 128)
    tile = min(cap, _round_up(hw, 128))
    return tile, _round_up(hw, tile)


# --------------------------- Pallas kernels ---------------------------------

def _resize_kernel(x_ref, rl_ref, rr_ref, o_ref):
    # Fused separable resize / avg-pool: o = rl @ x @ rr.  bf16 MXU operands,
    # f32 accumulation; the (Hout, Win) intermediate never leaves VMEM.
    t = jnp.dot(rl_ref[...].astype(jnp.bfloat16),
                x_ref[...].astype(jnp.bfloat16),
                preferred_element_type=jnp.float32)
    o_ref[...] = jnp.dot(t.astype(jnp.bfloat16),
                         rr_ref[...].astype(jnp.bfloat16),
                         preferred_element_type=jnp.float32)


def _encoder_kernel(x_ref, w_ref, b_ref, wt_ref, bt_ref, feat_ref, tao_ref,
                    colsum_acc, *, hw_valid):
    # Synthetic encoder head, tiled over the flattened spatial dim:
    #   feats = w @ x + b   as 3 VPU broadcast-FMAs over a (C, t_hw) block,
    #   tao   = w_tao . GAP(feats) + b_tao, GAP accumulated across tiles
    # (padded columns of x are zero, so the column-sum is the valid-area sum).
    t = pl.program_id(1)
    nt = pl.num_programs(1)

    @pl.when(t == 0)
    def _():
        colsum_acc[...] = jnp.zeros_like(colsum_acc)
        tao_ref[...] = jnp.zeros_like(tao_ref)

    x = x_ref[...]                                          # (3, t_hw) f32
    w = w_ref[...]                                          # (Cf, 3)
    f = (w[:, 0:1] * x[0:1, :] + w[:, 1:2] * x[1:2, :]
         + w[:, 2:3] * x[2:3, :] + b_ref[...])              # (Cf, t_hw) f32
    feat_ref[...] = f.astype(feat_ref.dtype)                # bf16, lane-dense
    colsum_acc[...] += jnp.sum(x, axis=1, keepdims=True)    # (3, 1)

    @pl.when(t == nt - 1)
    def _():
        s = colsum_acc[...]
        gap = (w[:, 0:1] * s[0, 0] + w[:, 1:2] * s[1, 0]
               + w[:, 2:3] * s[2, 0]) * (1.0 / hw_valid) + b_ref[...]  # (Cf, 1)
        tao_ref[...] = (jnp.sum(wt_ref[...] * gap, axis=0, keepdims=True)
                        + bt_ref[...])


def _masked_pool_kernel(md_ref, f_ref, o_ref, num_acc, den_acc, *, n_shots):
    # Masked average pooling (getFeatures + getPrototype): for each (epi, way)
    # accumulate  sum_hw(md * f) / (sum_hw(md) + 1e-5)  over (shot, hw-chunk);
    # one MXU contraction per block.  Padded columns of md are zero (inert).
    s = pl.program_id(2)
    c = pl.program_id(3)
    nc = pl.num_programs(3)

    @pl.when(jnp.logical_and(s == 0, c == 0))
    def _():
        o_ref[...] = jnp.zeros_like(o_ref)

    @pl.when(c == 0)
    def _():
        num_acc[...] = jnp.zeros_like(num_acc)
        den_acc[...] = jnp.zeros_like(den_acc)

    md = md_ref[...]                                        # (1, t_hw) f32
    f = f_ref[...].astype(jnp.float32)                      # (C, t_hw)
    num_acc[...] += jax.lax.dot_general(                    # md @ f^T -> (1, C)
        md, f, (((1,), (1,)), ((), ())), preferred_element_type=jnp.float32)
    den_acc[...] += jnp.sum(md, keepdims=True)              # == sum(full-res mask)

    @pl.when(c == nc - 1)
    def _():
        o_ref[...] += num_acc[...] / (den_acc[...] + 1e-5) * (1.0 / n_shots)


def _get_pred_kernel(f_ref, p_ref, t_ref, o_ref, invf_acc, *, scaler):
    # getPred: cosine similarity vs prototype + sigmoid threshold, lane-dense
    # (1, t_hw) output block.  Ways are the innermost grid axis, so the query
    # tile stays resident and its inverse norm is computed once per (epi,q,tile).
    # Dot runs on the MXU with bf16 operands / f32 accumulation (~1e-3 rel. vs
    # the all-f32 PyTorch reference); norms are f32; rsqrt goes to the EUP.
    e = pl.program_id(0)
    q = pl.program_id(1)
    w = pl.program_id(3)

    f = f_ref[...]                                          # (C, t_hw) bf16

    @pl.when(w == 0)
    def _():
        f32 = f.astype(jnp.float32)
        fsq = jnp.sum(f32 * f32, axis=0, keepdims=True)     # (1, t_hw)
        invf_acc[...] = jax.lax.rsqrt(jnp.maximum(fsq, 1e-16))  # 1/max(|f|,1e-8)

    p = p_ref[...]                                          # (1, C) f32
    dot = jnp.dot(p.astype(jnp.bfloat16), f,
                  preferred_element_type=jnp.float32)       # (1, t_hw)
    psq = jnp.sum(p * p, keepdims=True)                     # (1, 1)
    inv_p = jax.lax.rsqrt(jnp.maximum(psq, 1e-16))          # 1/max(|p|,1e-8)
    thr = t_ref[e, q]                                       # per-query tao (SMEM)
    sim = -(dot * invf_acc[...] * inv_p) * scaler
    o_ref[...] = 1.0 - jax.nn.sigmoid(0.5 * (sim - thr))


# --------------------------- Model ------------------------------------------

class FewShotSegPallas:
    """JAX/Pallas port of FewShotSeg.forward (inference, empty-mask branch)."""

    def __init__(self, key, feat_dim=32):
        self.scaler = 20.0
        self.threshold = 0.5
        self.feat_dim = feat_dim
        k1, k2, k3, k4 = jax.random.split(key, 4)
        # TODO(synk): Res101Encoder is replaced by a deterministic synthetic head
        # (4x4 avg-pool + 1x1 conv + GAP->tao); pretrained ResNet-101 weights
        # cannot be reproduced in-script.
        self.w_enc = 0.1 * jax.random.normal(k1, (feat_dim, 3), jnp.float32)
        self.b_enc = 0.1 * jax.random.normal(k2, (feat_dim, 1), jnp.float32)
        self.w_tao = 0.1 * jax.random.normal(k3, (feat_dim, 1), jnp.float32)
        self.b_tao = 0.1 * jax.random.normal(k4, (1, 1), jnp.float32)
        # TODO(synk): MLP(cons_num, sample_num) / Decoder(sample_num) are only
        # used in the non-empty-mask branch, which is not translated.

    # -------- static interpolation / pooling matrices (host numpy) ----------
    @staticmethod
    def _bilinear_matrix_np(out_size, in_size):
        i = np.arange(out_size)
        if out_size == 1:
            src = np.zeros(out_size, dtype=np.float64)
        else:
            src = i * (in_size - 1) / (out_size - 1)
        lo = np.minimum(np.floor(src).astype(np.int64), in_size - 1)
        hi = np.minimum(lo + 1, in_size - 1)
        w_hi = (src - lo).astype(np.float32)
        w_lo = 1.0 - w_hi
        M = np.zeros((out_size, in_size), np.float32)
        M[i, lo] += w_lo
        M[i, hi] += w_hi
        return M

    @staticmethod
    def _avgpool_matrix_np(in_size, factor):
        out = in_size // factor
        M = np.zeros((out, in_size), np.float32)
        for o in range(out):
            M[o, o * factor:(o + 1) * factor] = 1.0 / factor
        return M

    # -------- gridded Pallas wrappers ----------------------------------------
    @staticmethod
    def _pallas_resize(x, rl, rr):
        # x: (B, Hin, Win) -> (B, Hout, Wout) via o = rl @ x @ rr (bf16 MXU).
        B, Hin, Win = x.shape
        Hout, Wout = rl.shape[0], rr.shape[1]
        return pl.pallas_call(
            _resize_kernel,
            grid=(B,),
            in_specs=[
                pl.BlockSpec((None, Hin, Win), lambda b: (b, 0, 0)),
                pl.BlockSpec((Hout, Hin), lambda b: (0, 0)),
                pl.BlockSpec((Win, Wout), lambda b: (0, 0)),
            ],
            out_specs=pl.BlockSpec((None, Hout, Wout), lambda b: (b, 0, 0)),
            out_shape=jax.ShapeDtypeStruct((B, Hout, Wout), jnp.float32),
            compiler_params=pltpu.CompilerParams(
                dimension_semantics=("parallel",)),
        )(x.astype(jnp.float32), rl, rr)

    def _pallas_encoder(self, x_pad, hw_valid, t_hw):
        # x_pad: (N, 3, HWp) pooled images, zero-padded past hw_valid.
        # -> feats (N, Cf, HWp) bf16 lane-dense, tao (N, 1, 1) f32.
        N, Cin, HWp = x_pad.shape
        Cf = self.feat_dim
        n_t = HWp // t_hw
        return pl.pallas_call(
            functools.partial(_encoder_kernel, hw_valid=float(hw_valid)),
            grid=(N, n_t),
            in_specs=[
                pl.BlockSpec((None, Cin, t_hw), lambda n, t: (n, 0, t)),
                pl.BlockSpec((Cf, Cin), lambda n, t: (0, 0)),
                pl.BlockSpec((Cf, 1), lambda n, t: (0, 0)),
                pl.BlockSpec((Cf, 1), lambda n, t: (0, 0)),
                pl.BlockSpec((1, 1), lambda n, t: (0, 0)),
            ],
            out_specs=[
                pl.BlockSpec((None, Cf, t_hw), lambda n, t: (n, 0, t)),
                pl.BlockSpec((None, 1, 1), lambda n, t: (n, 0, 0)),
            ],
            out_shape=[
                jax.ShapeDtypeStruct((N, Cf, HWp), jnp.bfloat16),
                jax.ShapeDtypeStruct((N, 1, 1), jnp.float32),
            ],
            scratch_shapes=[pltpu.VMEM((Cin, 1), jnp.float32)],
            compiler_params=pltpu.CompilerParams(
                dimension_semantics=("parallel", "arbitrary"),
                vmem_limit_bytes=32 * 1024 * 1024),
        )(x_pad.astype(jnp.float32), self.w_enc, self.b_enc,
          self.w_tao, self.b_tao)

    def _pallas_prototypes(self, md, feats, t_hw):
        # md:    (supp_bs, n_ways, n_shots, 1, HWp) adjoint-downsampled masks
        # feats: (supp_bs, n_ways, n_shots, C, HWp) support features (bf16)
        supp_bs, n_ways, n_shots, _, HWp = md.shape
        C = feats.shape[-2]
        n_chunks = HWp // t_hw
        return pl.pallas_call(
            functools.partial(_masked_pool_kernel, n_shots=n_shots),
            grid=(supp_bs, n_ways, n_shots, n_chunks),
            in_specs=[
                pl.BlockSpec((None, None, None, 1, t_hw),
                             lambda e, w, s, c: (e, w, s, 0, c)),
                pl.BlockSpec((None, None, None, C, t_hw),
                             lambda e, w, s, c: (e, w, s, 0, c)),
            ],
            out_specs=pl.BlockSpec((None, None, 1, C),
                                   lambda e, w, s, c: (e, w, 0, 0)),
            out_shape=jax.ShapeDtypeStruct((supp_bs, n_ways, 1, C),
                                           jnp.float32),
            scratch_shapes=[pltpu.VMEM((1, C), jnp.float32),
                            pltpu.VMEM((1, 1), jnp.float32)],
            compiler_params=pltpu.CompilerParams(
                dimension_semantics=("parallel", "parallel", "arbitrary",
                                     "arbitrary"),
                vmem_limit_bytes=32 * 1024 * 1024),
        )(md.astype(jnp.float32), feats)

    def _pallas_get_pred(self, qry, protos, thresh, t_hw):
        # qry:    (qry_bs, n_queries, C, HWp) query features (bf16)
        # protos: (supp_bs, n_ways, 1, C)     prototypes (f32)
        # thresh: (qry_bs, n_queries)         per-query tao (SMEM scalars)
        qry_bs, n_queries, C, HWp = qry.shape
        supp_bs, n_ways = protos.shape[:2]
        n_tiles = HWp // t_hw
        out = pl.pallas_call(
            functools.partial(_get_pred_kernel, scaler=self.scaler),
            grid=(supp_bs, n_queries, n_tiles, n_ways),
            in_specs=[
                pl.BlockSpec((None, None, C, t_hw),
                             lambda e, q, h, w: (e, q, 0, h)),
                pl.BlockSpec((None, None, 1, C),
                             lambda e, q, h, w: (e, w, 0, 0)),
                pl.BlockSpec(memory_space=pltpu.MemorySpace.SMEM),
            ],
            out_specs=pl.BlockSpec((None, None, None, 1, t_hw),
                                   lambda e, q, h, w: (e, q, w, 0, h)),
            out_shape=jax.ShapeDtypeStruct(
                (supp_bs, n_queries, n_ways, 1, HWp), jnp.float32),
            scratch_shapes=[pltpu.VMEM((1, t_hw), jnp.float32)],
            compiler_params=pltpu.CompilerParams(
                dimension_semantics=("parallel", "parallel", "parallel",
                                     "arbitrary"),
                vmem_limit_bytes=32 * 1024 * 1024),
        )(qry, protos.astype(jnp.float32), thresh.astype(jnp.float32))
        return out[:, :, :, 0, :]                # (supp_bs, n_queries, n_ways, HWp)

    # -------- forward --------------------------------------------------------
    def forward(self, supp_imgs, supp_mask, qry_imgs, train=False):
        n_ways = len(supp_imgs)
        n_shots = len(supp_imgs[0])
        n_queries = len(qry_imgs)
        assert n_ways == 1 and n_queries == 1
        qry_bs = qry_imgs[0].shape[0]
        supp_bs = supp_imgs[0][0].shape[0]
        assert qry_bs >= supp_bs
        H, W = supp_imgs[0][0].shape[-2:]
        Hf, Wf = H // 4, W // 4
        HWf = Hf * Wf
        Cf = self.feat_dim
        n_supp = n_ways * n_shots * supp_bs

        # shared spatial tile / padded extent for the feature-streaming kernels
        t_hw, HWp = _plan_hw(HWf, Cf, itemsize=2)

        supp_mask_t = jnp.stack([jnp.stack(way, axis=0) for way in supp_mask],
                                axis=0)
        supp_mask_t = supp_mask_t.reshape(supp_bs, n_ways, n_shots, H, W)

        imgs_concat = jnp.concatenate(
            [jnp.concatenate(way, axis=0) for way in supp_imgs] +
            [jnp.concatenate(qry_imgs, axis=0)], axis=0)
        N = imgs_concat.shape[0]

        # Interpolation / pooling matrices (static host numpy constants).
        Ph = jnp.asarray(self._avgpool_matrix_np(H, 4))          # (Hf, H)
        PwT = jnp.asarray(self._avgpool_matrix_np(W, 4).T)       # (W, Wf)
        Mh = self._bilinear_matrix_np(H, Hf)                     # (H, Hf)
        Mw = self._bilinear_matrix_np(W, Wf)                     # (W, Wf)
        Rh, RhT = jnp.asarray(Mh), jnp.asarray(Mh.T)
        Rw, RwT = jnp.asarray(Mw), jnp.asarray(Mw.T)

        # --- encoder: 4x4 avg-pool (resize kernel) + 1x1 conv + GAP -> tao ---
        pooled = self._pallas_resize(imgs_concat.reshape(N * 3, H, W), Ph, PwT)
        pooled = pooled.reshape(N, 3, HWf)
        x_pad = jnp.pad(pooled, ((0, 0), (0, 0), (0, HWp - HWf)))
        feats, tao = self._pallas_encoder(x_pad, HWf, t_hw)      # (N,Cf,HWp) bf16
        tao = tao.reshape(N, 1)

        supp_fts = feats[:n_supp].reshape(supp_bs, n_ways, n_shots, Cf, HWp)
        qry_fts = feats[n_supp:].reshape(qry_bs, n_queries, Cf, HWp)
        # Per-(episode, query) tao threshold; the reference broadcasts the
        # query taos against the sim map, which is only well defined when that
        # broadcast is a scalar — this indexing matches that case exactly.
        thresh = tao[n_supp:].reshape(qry_bs, n_queries)

        # getFeatures as its adjoint: downsample the mask with Mh^T @ m @ Mw
        # (unit row sums => sum(md) == sum(full-res mask)) and pool the raw
        # (C, HWf) features — identical up to fp reordering to upsampling the
        # C-channel features to (H, W).  Padded columns of md are zero.
        masks_flat = supp_mask_t.reshape(supp_bs * n_ways * n_shots, H, W)
        md = self._pallas_resize(masks_flat, RhT, Rw)            # (B*, Hf, Wf)
        md = md.reshape(supp_bs, n_ways, n_shots, 1, HWf)
        md = jnp.pad(md, ((0, 0),) * 4 + ((0, HWp - HWf),))

        # Only the `supp_mask[epi][0].sum() == 0` branch of the reference
        # forward is translated; the episode loop is folded into the grids.
        # TODO(synk): the non-empty-mask branch (get_fg_pts / get_bg_pts /
        # cross_layers / sparse_supp_sampling / MLP / Decoder) relies on
        # host-side random.sample and torch.nonzero dynamic shapes; not ported.
        protos = self._pallas_prototypes(md, supp_fts, t_hw)     # (bs,ways,1,C)
        qry_pred = self._pallas_get_pred(qry_fts, protos, thresh, t_hw)
        qry_pred = qry_pred[..., :HWf].reshape(
            supp_bs * n_queries * n_ways, Hf, Wf)
        up = self._pallas_resize(qry_pred, Rh, RwT)              # (B2, H, W)
        up = up.reshape(supp_bs, n_queries, n_ways, H, W)
        preds = jnp.concatenate([1.0 - up, up], axis=2)          # (bs,Nq,2*ways,H,W)

        # Match the reference stacking order (episodes stacked at dim=1).
        output = jnp.transpose(preds, (1, 0, 2, 3, 4)).reshape(
            -1, 2 * n_ways, H, W)
        align_loss = jnp.zeros((1,), jnp.float32)
        mse_loss = jnp.zeros((1,), jnp.float32)
        # TODO(synk): train-time alignLoss / align_aux_Loss / get_mse_loss not ported.
        return output, align_loss / supp_bs, mse_loss / supp_bs


# --------------------------- main --------------------------------------------

if __name__ == "__main__":
    key = jax.random.PRNGKey(0)
    k_model, k_s, k_q = jax.random.split(key, 3)
    model = FewShotSegPallas(k_model, feat_dim=32)

    B, H, W = 2, 32, 32
    supp_img = jax.random.normal(k_s, (B, 3, H, W), jnp.float32)
    qry_img = jax.random.normal(k_q, (B, 3, H, W), jnp.float32)
    # all-zero support mask selects the translated branch of the forward pass
    supp_mask = jnp.zeros((B, H, W), jnp.float32)

    supp_imgs = [[supp_img]]        # way x shot x (B, 3, H, W)
    supp_masks = [[supp_mask]]      # way x shot x (B, H, W)
    qry_imgs = [qry_img]            # n_queries x (B, 3, H, W)

    out, align_loss, mse_loss = model.forward(supp_imgs, supp_masks, qry_imgs,
                                              train=False)
    out = jax.block_until_ready(out)
    assert out.shape == (B, 2, H, W), out.shape
    assert bool(jnp.all(jnp.isfinite(out)))
    print("KERNEL_OK")
</pallas_src>

<mosaic_0001>
module attributes {stable_mosaic.version = 11 : i64} {
  func.func @_resize_kernel(%arg0: i32, %arg1: memref<1x32x32xf32, #tpu.memory_space<vmem>>, %arg2: memref<8x32xf32, #tpu.memory_space<vmem>>, %arg3: memref<32x8xf32, #tpu.memory_space<vmem>>, %arg4: memref<1x8x8xf32, #tpu.memory_space<vmem>>) attributes {dimension_semantics = [#tpu.dimension_semantics<parallel>], iteration_bounds = array<i64: 12>, scalar_prefetch = 0 : i64, scratch_operands = 0 : i64, tpu.core_type = #tpu.core_type<tc>, window_params = [{transform_indices = @transform_0, window_bounds = array<i64: 1, 32, 32>}, {pipeline_mode = #tpu.pipeline_mode<synchronous>, transform_indices = @transform_1, window_bounds = array<i64: 8, 32>}, {pipeline_mode = #tpu.pipeline_mode<synchronous>, transform_indices = @transform_2, window_bounds = array<i64: 32, 8>}, {transform_indices = @transform_3, window_bounds = array<i64: 1, 8, 8>}]} {
    %c0 = arith.constant 0 : index
    %c0_0 = arith.constant 0 : index
    %0 = vector.load %arg2[%c0, %c0_0] : memref<8x32xf32, #tpu.memory_space<vmem>>, vector<8x32xf32>
    %1 = arith.truncf %0 : vector<8x32xf32> to vector<8x32xbf16>
    %c0_1 = arith.constant 0 : index
    %c0_2 = arith.constant 0 : index
    %c0_3 = arith.constant 0 : index
    %2 = vector.load %arg1[%c0_1, %c0_2, %c0_3] : memref<1x32x32xf32, #tpu.memory_space<vmem>>, vector<1x32x32xf32>
    %3 = vector.shape_cast %2 : vector<1x32x32xf32> to vector<32x32xf32>
    %4 = arith.truncf %3 : vector<32x32xf32> to vector<32x32xbf16>
    %cst = arith.constant dense<0.000000e+00> : vector<8x32xf32>
    %5 = tpu.matmul %1, %4, %cst {dimension_numbers = #tpu.dot_dimension_numbers<[1], [0], [0], [1], [0, 0, 1, 1], [], []>} : vector<8x32xbf16>, vector<32x32xbf16>, vector<8x32xf32> -> vector<8x32xf32>
    %6 = arith.truncf %5 : vector<8x32xf32> to vector<8x32xbf16>
    %c0_4 = arith.constant 0 : index
    %c0_5 = arith.constant 0 : index
    %7 = vector.load %arg3[%c0_4, %c0_5] : memref<32x8xf32, #tpu.memory_space<vmem>>, vector<32x8xf32>
    %8 = arith.truncf %7 : vector<32x8xf32> to vector<32x8xbf16>
    %cst_6 = arith.constant dense<0.000000e+00> : vector<8x8xf32>
    %9 = tpu.matmul %6, %8, %cst_6 {dimension_numbers = #tpu.dot_dimension_numbers<[1], [0], [0], [1], [0, 0, 1, 1], [], []>} : vector<8x32xbf16>, vector<32x8xbf16>, vector<8x8xf32> -> vector<8x8xf32>
    %c0_7 = arith.constant 0 : index
    %c0_8 = arith.constant 0 : index
    %c0_9 = arith.constant 0 : index
    %10 = vector.load %arg4[%c0_7, %c0_8, %c0_9] : memref<1x8x8xf32, #tpu.memory_space<vmem>>, vector<1x8x8xf32>
    %11 = vector.shape_cast %10 : vector<1x8x8xf32> to vector<8x8xf32>
    %12 = vector.shape_cast %9 : vector<8x8xf32> to vector<1x8x8xf32>
    tpu.vector_store %arg4[%c0_7, %c0_8, %c0_9], %12 {strides = array<i32>} : memref<1x8x8xf32, #tpu.memory_space<vmem>>, vector<1x8x8xf32>,
    return
  }
  func.func @transform_0(%arg0: i32) -> (i32, i32, i32) {
    %c0_i32 = arith.constant 0 : i32
    %c0_i32_0 = arith.constant 0 : i32
    %c0_i32_1 = arith.constant 0 : i32
    return %arg0, %c0_i32, %c0_i32_0 : i32, i32, i32
  }
  func.func @transform_1(%arg0: i32) -> (i32, i32) {
    %c0_i32 = arith.constant 0 : i32
    %c0_i32_0 = arith.constant 0 : i32
    %c0_i32_1 = arith.constant 0 : i32
    return %c0_i32, %c0_i32_0 : i32, i32
  }
  func.func @transform_2(%arg0: i32) -> (i32, i32) {
    %c0_i32 = arith.constant 0 : i32
    %c0_i32_0 = arith.constant 0 : i32
    %c0_i32_1 = arith.constant 0 : i32
    return %c0_i32, %c0_i32_0 : i32, i32
  }
  func.func @transform_3(%arg0: i32) -> (i32, i32, i32) {
    %c0_i32 = arith.constant 0 : i32
    %c0_i32_0 = arith.constant 0 : i32
    %c0_i32_1 = arith.constant 0 : i32
    return %arg0, %c0_i32, %c0_i32_0 : i32, i32, i32
  }
}

</mosaic_0001>

<bundles_post_ra>
// kernel: tpu_custom_call.1
= control target key start
LH: loop header
LB: loop body
LE: loop exit
PB: predicated region body
PF: predicated region fallthrough
CT: control target
= control target key end

     0   :  { %8 = vsyncpa [#allocation3], 0  ;;  %s652_s0 = inlined_call_operand.hbm [shape: f32[12,32,32], index: 0, kind: input, shape index: {}]   ;;  %s653_s1 = inlined_call_operand.vmem [shape: f32[8,32], index: 1, kind: input, shape index: {}]   ;;  %s654_s2 = inlined_call_operand.vmem [shape: f32[32,8], index: 2, kind: input, shape index: {}]   ;;  %s655_s3 = inlined_call_operand.vmem [shape: f32[12,8,8], index: 3, kind: output, shape index: {}]  }
   0x1   :  { %10 = vsyncpa [#allocation3 + $0x1], 0  ;;  %s529_s12 = smov 0   ;;  %s531_s13 = smov 0  }
   0x2   :  { %s533_s14 = smov 0   ;;  %s535_s15 = smov 0  }
   0x3 LB: > { %s548_s16 = sadd.s32 4294967295, %s502_s15   ;;  %s551_s17 = sadd.s32 1, %s502_s15   ;;  %s502_s15 = sphi %s535_s15, %s662_s15   ;;  %s498_s14 = sphi %s533_s14, %s661_s14   ;;  %s494_s13 = sphi %s531_s13, %s660_s13   ;;  %s490_s12 = sphi %s529_s12, %s659_s12  }
   0x4   : > { %s20_s18 = ssub.s32 %s502_s15, %s551_s17  ;;  %s23_s19 = sadd.s32 1, %s498_s14 }
   0x5   : > { %p21_p0 = scmp.eq.s32.totalorder %s20_s18, 0  ;;  %p30_p1 = scmp.ne.s32.totalorder %s498_s14, %s494_s13 }
   0x6   : > { %p31_p2 = scmp.eq.s32.totalorder %s502_s15, 0  ;;  %p36_p3 = scmp.ne.s32.totalorder %s494_s13, %s490_s12 }
   0x7   : > { %s561_s20 = scalar_select %p21_p0, %s498_s14, %s23_s19  }
   0x8   : > { %p32_p4 = por %p31_p2, %p30_p1  ;;  %p37_p5 = scmp.eq.s32.totalorder %s548_s16, 0 }
   0x9   : > { %p401_p6 = scmp.lt.s32.totalorder %s502_s15, 12  ;;  %s134_s22 = sand.u32 1, %s498_s14  }
   0xa   : > { %p565_p7 = por %p37_p5, %p36_p3  ;;  %s362_s23 = sshll.u32 %s134_s22, 5 }
   0xb   : > { %s372_s24 = sshll.u32 %s502_s15, 9  ;;  %s138_s28 = scalar_lea.vmem [#allocation2], %s362_s23 }
   0xc   : > { %s574_s27 = scalar_lea.hbm %s652_s0, %s372_s24  ;;  %s145_s29 = sshll.u32 %s138_s28, 4  ;;  %s576_s29 = int_to_ptr.vmem [resolvable:$true] %s145_s29 }
   0xd   : > { %p578_p8 = pnand %p401_p6, %p32_p4  ;;  %s583_s4 = scalar_lea.sflag [#allocation3], %s134_s22 }
   0xe   : > { %s438_s5 = scalar_lea.hbm %s574_s27, 512  ;;  %s443_s8 = scalar_lea.hbm %s652_s0, 6144 }
   0xf   : > { %p439_p10 = scmp.ne.s32.totalorder %s574_s27, %s438_s5  ;;  %p440_p11 = pneg %p578_p8 }
  0x10   : > { %p444_p0 = scmp.lt.u32.totalorder %s574_s27, %s652_s0  ;;  %p445_p1 = scmp.lt.u32.totalorder %s443_s8, %s438_s5 }
  0x11   : > { %p441_p12 = pnand %p440_p11, %p439_p10  ;;  %p447_p3 = scmp.lt.u32.totalorder %s438_s5, %s574_s27 }
  0x12   : > { %p446_p2 = por %p445_p1, %p444_p0 }
  0x13   : > { %p442_p13 = pneg %p441_p12 }
  0x14   : > { %p448_p4 = por %p447_p3, %p446_p2 }
  0x16   : > { %p449_p5 = pnand %p448_p4, %p442_p13 }
  0x18   : > { %452 = shalt.err (!%p449_p5)
}
  0x19   : > { %s453_s11 = scalar_lea.vmem %s576_s29, 512  ;;  %s504_s12 = smov [#allocation2]  }
  0x1a   : > { %p454_p6 = scmp.ne.s32.totalorder %s576_s29, %s453_s11  ;;  %s458_s18 = sshll.u32 %s504_s12, 4  ;;  %s459_s18 = int_to_ptr.vmem [resolvable:$false] %s458_s18 }
  0x1b   : > { %s460_s19 = scalar_lea.vmem %s459_s18, 1024  ;;  %p461_p9 = scmp.lt.s32.totalorder %s576_s29, %s459_s18 }
  0x1c   : > { %p456_p10 = pnand %p454_p6, %p440_p11  ;;  %p462_p0 = scmp.lt.s32.totalorder %s460_s19, %s453_s11 }
  0x1e   : > { %p457_p12 = pneg %p456_p10  ;;  %p463_p1 = por %p462_p0, %p461_p9 }
  0x20   : > { %p464_p2 = pnand %p463_p1, %p457_p12 }
  0x22   : > { %467 = shalt.err (!%p464_p2)
}
  0x23   : > { %s505_s22 = smov 128   ;;  %s506_s23 = smov 8  }
  0x24   : > { %400 = dma.hbm_to_vmem [thread:$0]  (!%p578_p8), %s574_s27, 512, %s576_s29, %s583_s4, %s505_s22, %s505_s22, %s506_s23  }
  0x25   : > { %p153_p11 = scmp.lt.s32.totalorder %s502_s15, 13  ;;  %p658_p13 = scmp.ge.s32.totalorder %s502_s15, 1 }
  0x27   : > { %p154_p3 = pnand %p658_p13, %p153_p11 }
  0x28   : > { %s159_s24 = sand.u32 (!%p154_p3), 1, %s494_s13  }
  0x29   : > { %157 = sbr.rel (%p154_p3) target bundleno = 488 (0x1e8), region = 32  ;;  %s366_s25 = sshll.u32 (!%p154_p3), %s159_s24, 5 }
  0x2a   : > { %s160_s26 = scalar_lea.sflag (!%p154_p3), [#allocation3], %s159_s24  ;;  %s163_s28 = scalar_lea.vmem (!%p154_p3), [#allocation2], %s366_s25 }
  0x30   : > { %485 = dma.done.wait (%p565_p7), %s160_s26, 512  }
  0x31   : > { %487 = vsyncadd (%p565_p7), %s160_s26, 4294966784  ;;  %v507_v0 = vmov 0.0   ;;  %vm508_vm0 = vmmov 0   ;;  %v192_v1 = vld [vmem:[%s163_s28] sm:$0xff]  ;;  %v193_v2 = vld [vmem:[%s163_s28 + $0x8] sm:$0xff]  ;;  %vm198_vm1 = vcmask 261120  }
  0x32   : > { %379 = vmatprep.subr.bf16.mxu0 %v507_v0  ;;  %383 = vmatprep.mubr.msk.bf16.mxu0 %vm508_vm0, %v507_v0  ;;  %v194_v3 = vld [vmem:[%s163_s28 + $0x10] sm:$0xff]  ;;  %v196_v4 = vpack.c.bf16 %v193_v2, %v192_v1  ;;  %v195_v5 = vld [vmem:[%s163_s28 + $0x18] sm:$0xff]  ;;  %v243_v6 = vld [vmem:[%s654_s2] sm:$0xff]  ;;  %p185_p7 = scmp.lt.s32.totalorder %s548_s16, 11  ;;  %vm292_vm2 = vcmask 64512  }
  0x33   : > { %387 = vmatprep.subr.bf16.mxu1 %v507_v0  ;;  %391 = vmatprep.mubr.msk.bf16.mxu1 %vm508_vm0, %v507_v0  ;;  %v244_v7 = vld [vmem:[%s654_s2 + $0x8] sm:$0xff]  ;;  %v197_v8 = vpack.c.bf16 %v195_v5, %v194_v3  ;;  %v190_v9 = vld [vmem:[%s653_s1] sm:$0xff]  ;;  %v245_v12 = vld [vmem:[%s654_s2 + $0x10] sm:$0xff] }
  0x34   : > { %380 = vmatpush3.bf16.msra.mxu0 %v196_v4  ;;  %v247_v10 = vpack.c.bf16 %v244_v7, %v243_v6  ;;  %v191_v11 = vpack.c.bf16 %v190_v9, %v190_v9  ;;  %v246_v13 = vld [vmem:[%s654_s2 + $0x18] sm:$0xff]  ;;  %s664_s16 = smov (!%p185_p7, %s548_s16), 11 }
  0x35   : > { %381 = vmatprep.subr.bf16.mxu0 %v507_v0  ;;  %v248_v14 = vpack.c.bf16 %v246_v13, %v245_v12  ;;  %s367_s9 = sshll.u32 %s664_s16, 3 }
  0x36   : > { %388 = vmatpush3.bf16.msra.mxu1 %v247_v10  ;;  %s188_s12 = scalar_lea.vmem %s655_s3, %s367_s9 }
  0x37   : > { %389 = vmatprep.subr.bf16.mxu1 %v507_v0 }
  0x38   : > { %382 = vmatpush3.bf16.msra.mxu0 %v197_v8 }
  0x3a   : > { %390 = vmatpush3.bf16.msra.mxu1 %v248_v14 }
  0x3b   : > { %384 = vmatmul.mubr.msk.bf16.vlgmr.msra.gmra.mrb[0].mxu0 %vm198_vm1, %v191_v11 }
 0x10e   : > { %v236_v15 = vpop.f32.mrb[0].mxu0 }
 0x10f   : > { %v242_v16 = vpack.c.bf16 %v236_v15, %v236_v15  ;;  %v385_v17 = vpop.f32.mrb[1].mxu0 }
 0x110   : > { %v239_v18 = vpop.f32.mrb[2].mxu0 }
 0x111   : > { %v386_v19 = vpop.f32.mrb[3].mxu0  ;;  %392 = vmatmul.mubr.msk.bf16.vlgmr.msra.gmra.mrb[0].mxu1 %vm198_vm1, %v242_v16 }
 0x1e4   : > { %v286_v20 = vpop.f32.mrb[0].mxu1 }
 0x1e5   : > { %293 = vst.msk [vmem:[%s188_s12] sm:$0xff] %vm292_vm2, %v286_v20  ;;  %v393_v21 = vpop.f32.mrb[1].mxu1 }
 0x1e6   : > { %v289_v22 = vpop.f32.mrb[2].mxu1 }
 0x1e7   : > { %v394_v23 = vpop.f32.mrb[3].mxu1 }
 0x1e8 PF: > { %p13_p8 = scmp.ge.s32.totalorder %s551_s17, 14   ;;  %s659_s12 = smov %s494_s13 }
 0x1e9   : > { %s660_s13 = smov %s498_s14  ;;  %s661_s14 = smov %s561_s20 }
 0x1ea   : > { %s662_s15 = smov %s551_s17  ;;  %15 = sbr.rel (!%p13_p8) target bundleno = 3 (0x3), region = 72 }
 0x1f1   :  { %313 = vsyncpa [#allocation3], 1 }
 0x1f2   :  { %315 = vsyncpa [#allocation3 + $0x1], 1 }

</bundles_post_ra>
